<compile_context>
chip_gen: v6e
topology: v6e:2x2x1
jax: 0.10.0
libtpu: 0.0.40
codegen_flags: <defaults>
</compile_context>

<pallas_src>
import jax
import jax.numpy as jnp
from jax.experimental import pallas as pl
from jax.experimental.pallas import tpu as pltpu


def _mlp_kernel(x_ref, w1_ref, b1_ref, w2_ref, b2_ref, o_ref):
    # x = x.float()  (in-kernel cast; VPU slot has huge slack, saves an HBM pass)
    x = x_ref[...].astype(jnp.float32)
    # fc_the_prequel: x @ W1 + b1   (HIGHEST => true f32 semantics, K=10 is tiny)
    h = jnp.dot(x, w1_ref[...],
                preferred_element_type=jnp.float32,
                precision=jax.lax.Precision.HIGHEST)
    h = jnp.maximum(h + b1_ref[...], 0.0)          # ReLU
    # fc: h @ W2 + b2
    o = jnp.dot(h, w2_ref[...],
                preferred_element_type=jnp.float32,
                precision=jax.lax.Precision.HIGHEST)
    o_ref[...] = o + b2_ref[...]


def _round_up(n, m):
    return ((n + m - 1) // m) * m


def linear_classifier_forward(x, w1, b1, w2, b2, *, tile_b=8192):
    """Forward pass of LinearClassifier.

    x:  (B, 10) any float dtype (cast to f32 inside the kernel, matching x.float())
    w1: (10, 64), b1: (64,), w2: (64, 12), b2: (12,)
    returns (B, 12) float32
    """
    B, F = x.shape
    H = w1.shape[1]
    O = w2.shape[1]

    w1 = w1.astype(jnp.float32)
    w2 = w2.astype(jnp.float32)
    b1_2d = b1.reshape(1, H).astype(jnp.float32)
    b2_2d = b2.reshape(1, O).astype(jnp.float32)

    # Minimum sublane multiple depends on x's packing (f32: 8, bf16/f16: 16, int8: 32).
    mult = {4: 8, 2: 16, 1: 32}.get(jnp.dtype(x.dtype).itemsize, 8)

    # Batch tile: multiple of `mult`, no larger than the (rounded-up) batch.
    b_ceil = _round_up(B, mult)
    tile_b = min(_round_up(max(tile_b, mult), mult), b_ceil)
    # v7x: make sure there are >= 2 grid steps when the batch allows, so the
    # "parallel" grid axis can be sharded across both TensorCores.  (Halving an
    # 8K tile keeps us far above the ~512-row per-step-overhead knee, so this is
    # harmless on single-TC v5e/v6e.)
    if b_ceil >= 2 * mult:
        tile_b = min(tile_b, _round_up(pl.cdiv(B, 2), mult))
    tile_b = max(tile_b, mult)
    n_tiles = pl.cdiv(B, tile_b)

    # VMEM budget: x and out blocks are lane-padded to 128 lanes in VMEM (f32),
    # double-buffered -> 2 * 2 * 128 * 4 bytes per batch row, plus weights/margin.
    vmem_needed = 2 * 2 * tile_b * 128 * 4 + (2 << 20)
    vmem_limit = min(max(vmem_needed, 32 << 20), 56 << 20)

    cost = pl.CostEstimate(
        flops=2 * B * (F * H + H * O),
        transcendentals=0,
        bytes_accessed=B * (F * jnp.dtype(x.dtype).itemsize + O * 4)
        + (F * H + H + H * O + O) * 4,
    )

    out = pl.pallas_call(
        _mlp_kernel,
        out_shape=jax.ShapeDtypeStruct((B, O), jnp.float32),
        grid=(n_tiles,),
        in_specs=[
            # x is streamed tile-by-tile (double-buffered by Pallas); the final
            # block may be ragged (clipped DMA), rows are independent so that's safe.
            pl.BlockSpec((tile_b, F), lambda i: (i, 0)),
            # Weights/biases: constant block index -> loaded once, VMEM-resident.
            pl.BlockSpec((F, H), lambda i: (0, 0)),
            pl.BlockSpec((1, H), lambda i: (0, 0)),
            pl.BlockSpec((H, O), lambda i: (0, 0)),
            pl.BlockSpec((1, O), lambda i: (0, 0)),
        ],
        out_specs=pl.BlockSpec((tile_b, O), lambda i: (i, 0)),
        compiler_params=pltpu.CompilerParams(
            dimension_semantics=("parallel",),
            vmem_limit_bytes=vmem_limit,
        ),
        cost_estimate=cost,
    )(x, w1, b1_2d, w2, b2_2d)

    return out


def init_params(key, in_features=10, hidden=64, out_features=12):
    # Deterministic PyTorch-style uniform(-1/sqrt(fan_in), 1/sqrt(fan_in)) init.
    k1, k2, k3, k4 = jax.random.split(key, 4)
    bound1 = 1.0 / jnp.sqrt(in_features)
    bound2 = 1.0 / jnp.sqrt(hidden)
    w1 = jax.random.uniform(k1, (in_features, hidden), jnp.float32, -bound1, bound1)
    b1 = jax.random.uniform(k2, (hidden,), jnp.float32, -bound1, bound1)
    w2 = jax.random.uniform(k3, (hidden, out_features), jnp.float32, -bound2, bound2)
    b2 = jax.random.uniform(k4, (out_features,), jnp.float32, -bound2, bound2)
    return w1, b1, w2, b2


if __name__ == "__main__":
    key = jax.random.PRNGKey(0)
    kx, kx2, kx3, kp = jax.random.split(key, 4)
    F, H, O = 10, 64, 12  # shape = 10 input features
    w1, b1, w2, b2 = init_params(kp, in_features=F, hidden=H, out_features=O)

    def ref(x):
        xf = x.astype(jnp.float32)
        h = jnp.maximum(
            jnp.dot(xf, w1, precision=jax.lax.Precision.HIGHEST) + b1, 0.0)
        return jnp.dot(h, w2, precision=jax.lax.Precision.HIGHEST) + b2

    # 1) Small batch (single grid step, exact fit).
    B = 8
    x = jax.random.normal(kx, (B, F), jnp.float32)
    out = jax.block_until_ready(linear_classifier_forward(x, w1, b1, w2, b2))
    assert out.shape == (B, O)
    assert jnp.allclose(out, ref(x), atol=1e-5, rtol=1e-5)

    # 2) Non-divisible batch, user tile: grid=4 with a ragged final block (no pad/slice).
    B2 = 200
    x2 = jax.random.normal(kx2, (B2, F), jnp.float32)
    out2 = jax.block_until_ready(
        linear_classifier_forward(x2, w1, b1, w2, b2, tile_b=64)
    )
    assert out2.shape == (B2, O)
    assert jnp.allclose(out2, ref(x2), atol=1e-5, rtol=1e-5)

    # 3) Default tile path on the same batch (auto-split into >=2 tiles for v7x).
    out2b = jax.block_until_ready(linear_classifier_forward(x2, w1, b1, w2, b2))
    assert out2b.shape == (B2, O)
    assert jnp.allclose(out2b, ref(x2), atol=1e-5, rtol=1e-5)

    # 4) bf16 input exercises the in-kernel x.float() cast and the 16-sublane clamp.
    B3 = 48
    x3 = jax.random.normal(kx3, (B3, F), jnp.float32).astype(jnp.bfloat16)
    out3 = jax.block_until_ready(linear_classifier_forward(x3, w1, b1, w2, b2))
    assert out3.shape == (B3, O)
    assert jnp.allclose(out3, ref(x3), atol=1e-5, rtol=1e-5)

    print("KERNEL_OK")
</pallas_src>

<mosaic_0001>
module attributes {stable_mosaic.version = 11 : i64} {
  func.func @_mlp_kernel(%arg0: i32, %arg1: memref<8x10xf32, #tpu.memory_space<vmem>>, %arg2: memref<10x64xf32, #tpu.memory_space<vmem>>, %arg3: memref<1x64xf32, #tpu.memory_space<vmem>>, %arg4: memref<64x12xf32, #tpu.memory_space<vmem>>, %arg5: memref<1x12xf32, #tpu.memory_space<vmem>>, %arg6: memref<8x12xf32, #tpu.memory_space<vmem>>) attributes {dimension_semantics = [#tpu.dimension_semantics<parallel>], iteration_bounds = array<i64: 1>, scalar_prefetch = 0 : i64, scratch_operands = 0 : i64, tpu.core_type = #tpu.core_type<tc>, window_params = [{transform_indices = @transform_0, window_bounds = array<i64: 8, 10>}, {pipeline_mode = #tpu.pipeline_mode<synchronous>, transform_indices = @transform_1, window_bounds = array<i64: 10, 64>}, {pipeline_mode = #tpu.pipeline_mode<synchronous>, transform_indices = @transform_2, window_bounds = array<i64: 1, 64>}, {pipeline_mode = #tpu.pipeline_mode<synchronous>, transform_indices = @transform_3, window_bounds = array<i64: 64, 12>}, {pipeline_mode = #tpu.pipeline_mode<synchronous>, transform_indices = @transform_4, window_bounds = array<i64: 1, 12>}, {transform_indices = @transform_5, window_bounds = array<i64: 8, 12>}]} {
    %c0 = arith.constant 0 : index
    %c0_0 = arith.constant 0 : index
    %0 = vector.load %arg1[%c0, %c0_0] : memref<8x10xf32, #tpu.memory_space<vmem>>, vector<8x10xf32>
    %c0_1 = arith.constant 0 : index
    %c0_2 = arith.constant 0 : index
    %1 = vector.load %arg2[%c0_1, %c0_2] : memref<10x64xf32, #tpu.memory_space<vmem>>, vector<10x64xf32>
    %cst = arith.constant dense<0.000000e+00> : vector<8x64xf32>
    %2 = tpu.matmul %0, %1, %cst {dimension_numbers = #tpu.dot_dimension_numbers<[1], [0], [0], [1], [0, 0, 1, 1], [], []>, precision = #tpu.contract_precision<fp32>} : vector<8x10xf32>, vector<10x64xf32>, vector<8x64xf32> -> vector<8x64xf32>
    %c0_3 = arith.constant 0 : index
    %c0_4 = arith.constant 0 : index
    %3 = vector.load %arg3[%c0_3, %c0_4] : memref<1x64xf32, #tpu.memory_space<vmem>>, vector<1x64xf32>
    %4 = vector.broadcast %3 : vector<1x64xf32> to vector<8x64xf32>
    %5 = arith.addf %2, %4 : vector<8x64xf32>
    %cst_5 = arith.constant 0.000000e+00 : f32
    %6 = vector.broadcast %cst_5 : f32 to vector<8x64xf32>
    %7 = arith.maximumf %5, %6 : vector<8x64xf32>
    %c0_6 = arith.constant 0 : index
    %c0_7 = arith.constant 0 : index
    %8 = vector.load %arg4[%c0_6, %c0_7] : memref<64x12xf32, #tpu.memory_space<vmem>>, vector<64x12xf32>
    %cst_8 = arith.constant dense<0.000000e+00> : vector<8x12xf32>
    %9 = tpu.matmul %7, %8, %cst_8 {dimension_numbers = #tpu.dot_dimension_numbers<[1], [0], [0], [1], [0, 0, 1, 1], [], []>, precision = #tpu.contract_precision<fp32>} : vector<8x64xf32>, vector<64x12xf32>, vector<8x12xf32> -> vector<8x12xf32>
    %c0_9 = arith.constant 0 : index
    %c0_10 = arith.constant 0 : index
    %10 = vector.load %arg5[%c0_9, %c0_10] : memref<1x12xf32, #tpu.memory_space<vmem>>, vector<1x12xf32>
    %11 = vector.broadcast %10 : vector<1x12xf32> to vector<8x12xf32>
    %12 = arith.addf %9, %11 : vector<8x12xf32>
    %c0_11 = arith.constant 0 : index
    %c0_12 = arith.constant 0 : index
    %13 = vector.load %arg6[%c0_11, %c0_12] : memref<8x12xf32, #tpu.memory_space<vmem>>, vector<8x12xf32>
    tpu.vector_store %arg6[%c0_11, %c0_12], %12 {strides = array<i32>} : memref<8x12xf32, #tpu.memory_space<vmem>>, vector<8x12xf32>,
    return
  }
  func.func @transform_0(%arg0: i32) -> (i32, i32) {
    %c0_i32 = arith.constant 0 : i32
    %c0_i32_0 = arith.constant 0 : i32
    return %arg0, %c0_i32 : i32, i32
  }
  func.func @transform_1(%arg0: i32) -> (i32, i32) {
    %c0_i32 = arith.constant 0 : i32
    %c0_i32_0 = arith.constant 0 : i32
    %c0_i32_1 = arith.constant 0 : i32
    return %c0_i32, %c0_i32_0 : i32, i32
  }
  func.func @transform_2(%arg0: i32) -> (i32, i32) {
    %c0_i32 = arith.constant 0 : i32
    %c0_i32_0 = arith.constant 0 : i32
    %c0_i32_1 = arith.constant 0 : i32
    return %c0_i32, %c0_i32_0 : i32, i32
  }
  func.func @transform_3(%arg0: i32) -> (i32, i32) {
    %c0_i32 = arith.constant 0 : i32
    %c0_i32_0 = arith.constant 0 : i32
    %c0_i32_1 = arith.constant 0 : i32
    return %c0_i32, %c0_i32_0 : i32, i32
  }
  func.func @transform_4(%arg0: i32) -> (i32, i32) {
    %c0_i32 = arith.constant 0 : i32
    %c0_i32_0 = arith.constant 0 : i32
    %c0_i32_1 = arith.constant 0 : i32
    return %c0_i32, %c0_i32_0 : i32, i32
  }
  func.func @transform_5(%arg0: i32) -> (i32, i32) {
    %c0_i32 = arith.constant 0 : i32
    %c0_i32_0 = arith.constant 0 : i32
    return %arg0, %c0_i32 : i32, i32
  }
}

</mosaic_0001>

<bundles_post_ra>
// kernel: tpu_custom_call.1
= control target key start
LH: loop header
LB: loop body
LE: loop exit
PB: predicated region body
PF: predicated region fallthrough
CT: control target
= control target key end

     0   :  { %vm35_vm0 = vcmask 1041408   ;;  %v1326_v2 = vmov 0.0   ;;  %vm1327_vm1 = vmmov 0   ;;  %vm31_vm2 = vcmask 80896   ;;  %s1611_s0 = inlined_call_operand.vmem [shape: f32[8,10], index: 0, kind: input, shape index: {}]   ;;  %s1612_s1 = inlined_call_operand.vmem [shape: f32[10,64], index: 1, kind: input, shape index: {}]   ;;  %s1613_s2 = inlined_call_operand.vmem [shape: f32[1,64], index: 2, kind: input, shape index: {}]   ;;  %s1614_s3 = inlined_call_operand.vmem [shape: f32[64,12], index: 3, kind: input, shape index: {}]   ;;  %s1615_s4 = inlined_call_operand.vmem [shape: f32[1,12], index: 4, kind: input, shape index: {}]   ;;  %s1616_s5 = inlined_call_operand.hbm [shape: f32[8,12], index: 5, kind: output, shape index: {}]  }
   0x1   :  { %v23_v0 = vld [vmem:[%s1612_s1 + $0x8] sm:$0x3]  ;;  %v22_v1 = vld [vmem:[%s1612_s1] sm:$0xff]  ;;  %1145 = vmatprep.subr.mxu0 %v1326_v2  ;;  %1149 = vmatprep.mubr.msk.f32.mxu0 %vm1327_vm1, %v1326_v2 }
   0x2   :  { %v37_v3 = vsel %vm35_vm0, %v23_v0, 0  ;;  %v71_v4 = vand.u32 4294901760, %v22_v1  ;;  %v21_v5 = vld [vmem:[%s1611_s0] sm:$0xff]  ;;  %1152 = vmatprep.subr.mxu1 %v1326_v2  ;;  %1156 = vmatprep.mubr.msk.f32.mxu1 %vm1327_vm1, %v1326_v2 }
   0x3   :  { %v68_v6 = vand.u32 4294901760, %v37_v3  ;;  %v33_v7 = vsel %vm31_vm2, %v21_v5, 0 }
   0x4   :  { %10 = vsyncpa [#allocation3], 0  ;;  %v106_v8 = vand.u32 4294901760, %v33_v7  ;;  %v153_v9 = vsub.f32 %v22_v1, %v71_v4  ;;  %v506_v21 = vld [vmem:[%s1614_s3 + $0x38] sm:$0xff]  ;;  %v505_v23 = vld [vmem:[%s1614_s3 + $0x30] sm:$0xff]  ;;  %vm514_vm3 = vcmask 523264  }
   0x5   :  { %1146 = vmatpush3.msra.mxu0 %v68_v6  ;;  %v146_v10 = vsub.f32 %v37_v3, %v68_v6  ;;  %v1401_v22 = vand.u32 4294901760, %v506_v21  ;;  %v1409_v25 = vand.u32 4294901760, %v505_v23  ;;  %v504_v26 = vld [vmem:[%s1614_s3 + $0x28] sm:$0xff]  ;;  %v503_v30 = vld [vmem:[%s1614_s3 + $0x20] sm:$0xff]  ;;  %v502_v35 = vld [vmem:[%s1614_s3 + $0x18] sm:$0xff]  ;;  %s1328_s15 = smov [#allocation2]  }
   0x6   :  { %1147 = vmatprep.subr.mxu0 %v1326_v2  ;;  %v107_v11 = vsub.f32 %v33_v7, %v106_v8  ;;  %v154_v12 = vand.u32 4294901760, %v153_v9  ;;  %v1420_v29 = vand.u32 4294901760, %v504_v26  ;;  %v1434_v34 = vand.u32 4294901760, %v503_v30  ;;  %v501_v41 = vld [vmem:[%s1614_s3 + $0x10] sm:$0xff]  ;;  %v500_v47 = vld [vmem:[%s1614_s3 + $0x8] sm:$0xff]  ;;  %v499_v53 = vld [vmem:[%s1614_s3] sm:$0xff] }
   0x7   :  { %1148 = vmatpush3.msra.mxu0 %v71_v4  ;;  %v147_v13 = vand.u32 4294901760, %v146_v10  ;;  %v1407_v24 = vsub.f32 %v506_v21, %v1401_v22  ;;  %v1418_v28 = vsub.f32 %v505_v23, %v1409_v25  ;;  %v1449_v40 = vand.u32 4294901760, %v502_v35  ;;  %s1063_s16 = sshll.u32 %s1328_s15, 4  ;;  %s1064_s16 = int_to_ptr.vmem [resolvable:$true] %s1063_s16 }
   0x8   :  { %v108_v14 = vand.u32 4294901760, %v107_v11  ;;  %1159 = vmatprep.subr.mxu0 %v1326_v2  ;;  %v155_v15 = vsub.f32 %v153_v9, %v154_v12  ;;  %v1432_v33 = vsub.f32 %v504_v26, %v1420_v29  ;;  %v1446_v39 = vsub.f32 %v503_v30, %v1434_v34  ;;  %s1304_s17 = scalar_lea.vmem %s1064_s16, 128  ;;  %p1309_p1 = scmp.lt.s32.totalorder %s1064_s16, %s1064_s16 }
   0x9   :  { %v148_v16 = vsub.f32 %v146_v10, %v147_v13  ;;  %v620_v27 = vand.u32 4294901760, %v1407_v24  ;;  %v627_v32 = vand.u32 4294901760, %v1418_v28  ;;  %v1459_v45 = vand.u32 4294901760, %v501_v41  ;;  %p1305_p0 = scmp.ne.s32.totalorder %s1064_s16, %s1304_s17  ;;  %p1310_p2 = scmp.lt.s32.totalorder %s1304_s17, %s1304_s17 }
   0xa   :  { %v109_v17 = vsub.f32 %v107_v11, %v108_v14  ;;  %v156_v19 = vand.u32 4294901760, %v155_v15  ;;  %v634_v38 = vand.u32 4294901760, %v1432_v33  ;;  %v641_v44 = vand.u32 4294901760, %v1446_v39 }
   0xb   :  { %v149_v18 = vand.u32 4294901760, %v148_v16  ;;  %v621_v31 = vsub.f32 %v1407_v24, %v620_v27  ;;  %v628_v37 = vsub.f32 %v1418_v28, %v627_v32  ;;  %v1463_v46 = vsub.f32 %v502_v35, %v1449_v40  ;;  %p1311_p3 = por %p1310_p2, %p1309_p1 }
   0xc   :  { %v110_v20 = vand.u32 4294901760, %v109_v17  ;;  %v635_v43 = vsub.f32 %v1432_v33, %v634_v38  ;;  %v642_v49 = vsub.f32 %v1446_v39, %v641_v44  ;;  %v1473_v50 = vsub.f32 %v501_v41, %v1459_v45 }
   0xd   :  { %1153 = vmatpush3.msra.mxu1 %v149_v18  ;;  %v622_v36 = vand.u32 4294901760, %v621_v31  ;;  %v629_v42 = vand.u32 4294901760, %v628_v37  ;;  %v1475_v51 = vand.u32 4294901760, %v500_v47  ;;  %v648_v52 = vand.u32 4294901760, %v1463_v46  ;;  %p1312_p4 = pnand %p1311_p3, %p1305_p0 }
   0xe   :  { %1150 = vmatmul.mubr.f32.vlgmr.msra.gmra.mxu0 %v110_v20  ;;  %1154 = vmatprep.subr.mxu1 %v1326_v2  ;;  %v636_v48 = vand.u32 4294901760, %v635_v43  ;;  %v643_v54 = vand.u32 4294901760, %v642_v49  ;;  %v655_v55 = vand.u32 4294901760, %v1473_v50  ;;  %v1488_v57 = vand.u32 4294901760, %v499_v53 }
   0xf   :  { %1160 = vmatpush3.msra.mxu0 %v146_v10  ;;  %1155 = vmatpush3.msra.mxu1 %v156_v19  ;;  %v1486_v56 = vsub.f32 %v500_v47, %v1475_v51  ;;  %v649_v58 = vsub.f32 %v1463_v46, %v648_v52  ;;  %vm1055_vm4 = vcmask 97280  }
  0x10   :  { %1161 = vmatprep.subr.mxu0 %v1326_v2  ;;  %1157 = vmatmul.mubr.f32.vlgmr.msra.gmra.mxu1 %v106_v8  ;;  %v656_v59 = vsub.f32 %v1473_v50, %v655_v55  ;;  %v1501_v61 = vsub.f32 %v499_v53, %v1488_v57 }
  0x11   :  { %1162 = vmatpush3.msra.mxu0 %v153_v9  ;;  %1163 = vmatprep.mubr.msk.f32.mxu0 %vm1327_vm1, %v1326_v2  ;;  %v662_v60 = vand.u32 4294901760, %v1486_v56  ;;  %v650_v62 = vand.u32 4294901760, %v649_v58 }
  0x12   :  { %1166 = vmatprep.subr.mxu1 %v1326_v2  ;;  %1164 = vmatmul.mubr.f32.vlgmr.msra.gmra.mxu0 %v107_v11  ;;  %v657_v63 = vand.u32 4294901760, %v656_v59  ;;  %v669_v1 = vand.u32 4294901760, %v1501_v61 }
  0x13   :  { %1167 = vmatpush3.msra.mxu1 %v68_v6  ;;  %1173 = vmatprep.subr.mxu0 %v1326_v2  ;;  %v663_v0 = vsub.f32 %v1486_v56, %v662_v60 }
  0x14   :  { %1168 = vmatprep.subr.mxu1 %v1326_v2  ;;  %1174 = vmatpush3.msra.mxu0 %v147_v13 }
  0x15   :  { %1169 = vmatpush3.msra.mxu1 %v71_v4  ;;  %1170 = vmatprep.mubr.msk.f32.mxu1 %vm1327_vm1, %v1326_v2  ;;  %v664_v3 = vand.u32 4294901760, %v663_v0 }
  0x16   :  { %1175 = vmatprep.subr.mxu0 %v1326_v2  ;;  %1171 = vmatmul.mubr.f32.vlgmr.msra.gmra.mxu1 %v108_v14 }
  0x17   :  { %1176 = vmatpush3.msra.mxu0 %v154_v12  ;;  %1177 = vmatprep.mubr.msk.f32.mxu0 %vm1327_vm1, %v1326_v2 }
  0x18   :  { %1180 = vmatprep.subr.mxu1 %v1326_v2  ;;  %1178 = vmatmul.mubr.f32.vlgmr.msra.gmra.mxu0 %v106_v8 }
  0x19   :  { %1181 = vmatpush3.msra.mxu1 %v68_v6  ;;  %1184 = vmatprep.mubr.msk.f32.mxu1 %vm1327_vm1, %v1326_v2  ;;  %v1071_v6 = vld [vmem:[%s1613_s2] ss:$0 sm:$0xff] }
  0x1a   :  { %1182 = vmatprep.subr.mxu1 %v1326_v2  ;;  %1187 = vmatprep.subr.mxu0 %v1326_v2 }
  0x1b   :  { %1183 = vmatpush3.msra.mxu1 %v71_v4  ;;  %1203 = vmatprep.mubr.msk.f32.mxu0 %vm1327_vm1, %v1326_v2  ;;  %v670_v4 = vsub.f32 %v1501_v61, %v669_v1 }
  0x1c   :  { %1185 = vmatmul.mubr.f32.vlgmr.msra.gmra.mxu1 %v106_v8  ;;  %1206 = vmatprep.subr.mxu1 %v1326_v2 }
  0x1d   :  { %1222 = vmatprep.mubr.msk.f32.mxu1 %vm1327_vm1, %v1326_v2  ;;  %1188 = vmatpush3.msra.mxu0 %v1401_v22  ;;  %v671_v5 = vand.u32 4294901760, %v670_v4 }
  0x1e   :  { %1189 = vmatprep.subr.mxu0 %v1326_v2  ;;  %1207 = vmatpush3.msra.mxu1 %v622_v36 }
  0x1f   :  { %1190 = vmatpush3.msra.mxu0 %v1409_v25  ;;  %1208 = vmatprep.subr.mxu1 %v1326_v2 }
  0x20   :  { %1191 = vmatprep.subr.mxu0 %v1326_v2  ;;  %1209 = vmatpush3.msra.mxu1 %v629_v42 }
  0x21   :  { %1192 = vmatpush3.msra.mxu0 %v1420_v29  ;;  %1210 = vmatprep.subr.mxu1 %v1326_v2 }
  0x22   :  { %1193 = vmatprep.subr.mxu0 %v1326_v2  ;;  %1211 = vmatpush3.msra.mxu1 %v636_v48 }
  0x23   :  { %1194 = vmatpush3.msra.mxu0 %v1434_v34  ;;  %1212 = vmatprep.subr.mxu1 %v1326_v2 }
  0x24   :  { %1195 = vmatprep.subr.mxu0 %v1326_v2  ;;  %1213 = vmatpush3.msra.mxu1 %v643_v54 }
  0x25   :  { %1196 = vmatpush3.msra.mxu0 %v1449_v40  ;;  %1214 = vmatprep.subr.mxu1 %v1326_v2 }
  0x26   :  { %1197 = vmatprep.subr.mxu0 %v1326_v2  ;;  %1215 = vmatpush3.msra.mxu1 %v650_v62 }
  0x27   :  { %1198 = vmatpush3.msra.mxu0 %v1459_v45  ;;  %1216 = vmatprep.subr.mxu1 %v1326_v2 }
  0x28   :  { %1199 = vmatprep.subr.mxu0 %v1326_v2  ;;  %1217 = vmatpush3.msra.mxu1 %v657_v63 }
  0x29   :  { %1200 = vmatpush3.msra.mxu0 %v1475_v51  ;;  %1218 = vmatprep.subr.mxu1 %v1326_v2 }
  0x2a   :  { %1201 = vmatprep.subr.mxu0 %v1326_v2  ;;  %1219 = vmatpush3.msra.mxu1 %v664_v3 }
  0x2b   :  { %1202 = vmatpush3.msra.mxu0 %v1488_v57  ;;  %1220 = vmatprep.subr.mxu1 %v1326_v2 }
  0x2c   :  { %1225 = vmatprep.subr.mxu0 %v1326_v2  ;;  %1221 = vmatpush3.msra.mxu1 %v671_v5 }
  0x2d   :  { %1244 = vmatprep.subr.mxu1 %v1326_v2 }
  0xce   :  { %v112_v7 = vpop.f32.mrf.mxu0 }
  0xcf   :  { %v113_v8 = vadd.f32 %v1071_v6, %v112_v7 }
  0xd0   :  { %v1151_v9 = vpop.f32.mrf.mxu0  ;;  %v193_v10 = vpop.f32.mrf.mxu1 }
  0xd1   :  { %v194_v11 = vadd.f32 %v193_v10, %v113_v8 }
  0xd2   :  { %v269_v12 = vpop.f32.mrf.mxu0  ;;  %v1158_v13 = vpop.f32.mrf.mxu1 }
  0xd3   :  { %v270_v14 = vadd.f32 %v269_v12, %v194_v11 }
  0xd4   :  { %v1165_v15 = vpop.f32.mrf.mxu0 }
  0xd6   :  { %v344_v16 = vpop.f32.mrf.mxu1 }
  0xd7   :  { %v345_v17 = vadd.f32 %v344_v16, %v270_v14 }
  0xd8   :  { %v421_v18 = vpop.f32.mrf.mxu0  ;;  %v1172_v19 = vpop.f32.mrf.mxu1 }
  0xd9   :  { %v422_v20 = vadd.f32 %v421_v18, %v345_v17 }
  0xda   :  { %v1179_v21 = vpop.f32.mrf.mxu0 }
  0xdc   :  { %v494_v23 = vpop.f32.mrf.mxu1 }
  0xdd   :  { %v495_v26 = vadd.f32 %v494_v23, %v422_v20 }
  0xde   :  { %v1186_v30 = vpop.f32.mrf.mxu1 }
  0xdf   :  { %v498_v31 = vmax.f32 %v495_v26, 0.0 }
  0xe1   :  { %v516_v35 = vsel %vm514_vm3, %v498_v31, 0 }
  0xe2   :  { %v1521_v36 = vand.u32 4294901760, %v516_v35 }
  0xe4   :  { %v592_v37 = vsub.f32 %v516_v35, %v1521_v36  ;;  %1223 = vmatmul.mubr.f32.vlgmr.msra.gmra.mxu1 %v1521_v36 }
  0xe5   :  { %1245 = vmatpush3.msra.mxu1 %v1401_v22  ;;  %1260 = vmatprep.mubr.msk.f32.mxu1 %vm1327_vm1, %v1326_v2 }
  0xe6   :  { %v593_v41 = vand.u32 4294901760, %v592_v37  ;;  %1246 = vmatprep.subr.mxu1 %v1326_v2 }
  0xe7   :  { %1247 = vmatpush3.msra.mxu1 %v1409_v25 }
  0xe8   :  { %1248 = vmatprep.subr.mxu1 %v1326_v2  ;;  %v594_v42 = vsub.f32 %v592_v37, %v593_v41 }
  0xe9   :  { %1249 = vmatpush3.msra.mxu1 %v1420_v29 }
  0xea   :  { %1250 = vmatprep.subr.mxu1 %v1326_v2  ;;  %v595_v43 = vand.u32 4294901760, %v594_v42 }
  0xeb   :  { %1251 = vmatpush3.msra.mxu1 %v1434_v34 }
  0xec   :  { %1252 = vmatprep.subr.mxu1 %v1326_v2  ;;  %1204 = vmatmul.mubr.f32.vlgmr.msra.gmra.mxu0 %v595_v43 }
  0xed   :  { %1226 = vmatpush3.msra.mxu0 %v1407_v24  ;;  %1253 = vmatpush3.msra.mxu1 %v1449_v40 }
  0xee   :  { %1227 = vmatprep.subr.mxu0 %v1326_v2  ;;  %1254 = vmatprep.subr.mxu1 %v1326_v2 }
  0xef   :  { %1228 = vmatpush3.msra.mxu0 %v1418_v28  ;;  %1255 = vmatpush3.msra.mxu1 %v1459_v45 }
  0xf0   :  { %1229 = vmatprep.subr.mxu0 %v1326_v2  ;;  %1256 = vmatprep.subr.mxu1 %v1326_v2 }
  0xf1   :  { %1230 = vmatpush3.msra.mxu0 %v1432_v33  ;;  %1257 = vmatpush3.msra.mxu1 %v1475_v51 }
  0xf2   :  { %1231 = vmatprep.subr.mxu0 %v1326_v2  ;;  %1258 = vmatprep.subr.mxu1 %v1326_v2 }
  0xf3   :  { %1232 = vmatpush3.msra.mxu0 %v1446_v39  ;;  %1259 = vmatpush3.msra.mxu1 %v1488_v57 }
  0xf4   :  { %1233 = vmatprep.subr.mxu0 %v1326_v2  ;;  %1261 = vmatmul.mubr.f32.vlgmr.msra.gmra.mxu1 %v593_v41 }
  0xf5   :  { %1282 = vmatprep.subr.mxu1 %v1326_v2  ;;  %1234 = vmatpush3.msra.mxu0 %v1463_v46 }
  0xf6   :  { %1283 = vmatpush3.msra.mxu1 %v1401_v22  ;;  %1235 = vmatprep.subr.mxu0 %v1326_v2 }
  0xf7   :  { %1284 = vmatprep.subr.mxu1 %v1326_v2  ;;  %1236 = vmatpush3.msra.mxu0 %v1473_v50 }
  0xf8   :  { %1285 = vmatpush3.msra.mxu1 %v1409_v25  ;;  %1237 = vmatprep.subr.mxu0 %v1326_v2 }
  0xf9   :  { %1286 = vmatprep.subr.mxu1 %v1326_v2  ;;  %1238 = vmatpush3.msra.mxu0 %v1486_v56 }
  0xfa   :  { %1287 = vmatpush3.msra.mxu1 %v1420_v29  ;;  %1239 = vmatprep.subr.mxu0 %v1326_v2 }
  0xfb   :  { %1288 = vmatprep.subr.mxu1 %v1326_v2  ;;  %1240 = vmatpush3.msra.mxu0 %v1501_v61 }
  0xfc   :  { %1241 = vmatprep.mubr.msk.f32.mxu0 %vm1327_vm1, %v1326_v2  ;;  %1289 = vmatpush3.msra.mxu1 %v1434_v34  ;;  %v1072_v34 = vld [vmem:[%s1615_s4] ss:$0 sm:$0xff] }
  0xfd   :  { %1242 = vmatmul.mubr.f32.vlgmr.msra.gmra.mxu0 %v592_v37  ;;  %1263 = vmatprep.subr.mxu0 %v1326_v2 }
  0xfe   :  { %1290 = vmatprep.subr.mxu1 %v1326_v2  ;;  %1264 = vmatpush3.msra.mxu0 %v620_v27 }
  0xff   :  { %1291 = vmatpush3.msra.mxu1 %v1449_v40  ;;  %1265 = vmatprep.subr.mxu0 %v1326_v2 }
 0x100   :  { %1292 = vmatprep.subr.mxu1 %v1326_v2  ;;  %1266 = vmatpush3.msra.mxu0 %v627_v32 }
 0x101   :  { %1293 = vmatpush3.msra.mxu1 %v1459_v45  ;;  %1267 = vmatprep.subr.mxu0 %v1326_v2 }
 0x102   :  { %1294 = vmatprep.subr.mxu1 %v1326_v2  ;;  %1268 = vmatpush3.msra.mxu0 %v634_v38 }
 0x103   :  { %1295 = vmatpush3.msra.mxu1 %v1475_v51  ;;  %1269 = vmatprep.subr.mxu0 %v1326_v2 }
 0x104   :  { %1296 = vmatprep.subr.mxu1 %v1326_v2  ;;  %1270 = vmatpush3.msra.mxu0 %v641_v44 }
 0x105   :  { %1297 = vmatpush3.msra.mxu1 %v1488_v57  ;;  %1298 = vmatprep.mubr.msk.f32.mxu1 %vm1327_vm1, %v1326_v2 }
 0x106   :  { %1271 = vmatprep.subr.mxu0 %v1326_v2  ;;  %1299 = vmatmul.mubr.f32.vlgmr.msra.gmra.mxu1 %v1521_v36 }
 0x107   :  { %1272 = vmatpush3.msra.mxu0 %v648_v52  ;;  %1279 = vmatprep.mubr.msk.f32.mxu0 %vm1327_vm1, %v1326_v2 }
 0x108   :  { %1273 = vmatprep.subr.mxu0 %v1326_v2 }
 0x109   :  { %1274 = vmatpush3.msra.mxu0 %v655_v55 }
 0x10a   :  { %1275 = vmatprep.subr.mxu0 %v1326_v2 }
 0x10b   :  { %1276 = vmatpush3.msra.mxu0 %v662_v60 }
 0x10c   :  { %1277 = vmatprep.subr.mxu0 %v1326_v2 }
 0x10d   :  { %1278 = vmatpush3.msra.mxu0 %v669_v1 }
 0x10e   :  { %1280 = vmatmul.mubr.f32.vlgmr.msra.gmra.mxu0 %v1521_v36 }
 0x1a4   :  { %v708_v22 = vpop.f32.mrf.mxu1 }
 0x1a6   :  { %v1224_v24 = vpop.f32.mrf.mxu1 }
 0x1ac   :  { %v597_v25 = vpop.f32.mrf.mxu0 }
 0x1ad   :  { %v598_v38 = vadd.f32 %v1072_v34, %v597_v25 }
 0x1ae   :  { %v1205_v27 = vpop.f32.mrf.mxu0 }
 0x1af   :  { %v709_v2 = vadd.f32 %v708_v22, %v598_v38 }
 0x1b4   :  { %v877_v28 = vpop.f32.mrf.mxu1 }
 0x1b6   :  { %v1262_v29 = vpop.f32.mrf.mxu1 }
 0x1bd   :  { %v796_v32 = vpop.f32.mrf.mxu0 }
 0x1be   :  { %v797_v44 = vadd.f32 %v796_v32, %v709_v2 }
 0x1bf   :  { %v1243_v33 = vpop.f32.mrf.mxu0 }
 0x1c0   :  { %v878_v45 = vadd.f32 %v877_v28, %v797_v44 }
 0x1c6   :  { %v1051_v39 = vpop.f32.mrf.mxu1 }
 0x1c8   :  { %v1300_v40 = vpop.f32.mrf.mxu1 }
 0x1ce   :  { %v972_v46 = vpop.f32.mrf.mxu0 }
 0x1cf   :  { %v973_v47 = vadd.f32 %v972_v46, %v878_v45 }
 0x1d0   :  { %v1281_v48 = vpop.f32.mrf.mxu0 }
 0x1d1   :  { %v1052_v49 = vadd.f32 %v1051_v39, %v973_v47 }
 0x1d3   :  { %1056 = vst.msk [vmem:[#allocation2] sm:$0xff] %vm1055_vm4, %v1052_v49 }
 0x1d4   :  { %1315 = shalt.err (!%p1312_p4)
}
 0x1d5   :  { %1066 = dma.vmem_to_hbm [thread:$0]  %s1064_s16, 128, %s1616_s5, [#allocation3]  }
 0x1d6   :  { %1324 = dma.done.wait [#allocation3], 128  }
 0x1d7   :  { %1325 = vsyncadd [#allocation3], 4294967168 }
 0x1d8   :  { %1070 = vsyncpa [#allocation3], 1 }

</bundles_post_ra>
